<compile_context>
chip_gen: v7x
topology: tpu7x:2x2x1
jax: 0.10.0
libtpu: 0.0.40
codegen_flags: <defaults>
</compile_context>

<pallas_src>
import jax
import jax.numpy as jnp
from jax import lax
from jax.experimental import pallas as pl
from jax.experimental.pallas import tpu as pltpu

IN_FEATURES = 131
HIDDEN = 100
HIDDEN_PAD = 128          # zero-padded hidden width used inside the kernel
OUT_FEATURES = 1


def net1b_kernel(x_ref, w1_ref, b1_ref, w2_ref, b2_ref, o_ref):
    """sigmoid(W2 @ relu(W1 @ x^T + b1) + b2), with batch on the lane axis."""
    # fc1: (HID_PAD, 131) contracted with (TILE_B, 131) on the feature dim
    #      -> (HID_PAD, TILE_B).  MXU matmul with transposed RHS feed (same
    #      form as q @ k^T in attention kernels), f32 accumulation.
    h = lax.dot_general(
        w1_ref[...], x_ref[...],
        dimension_numbers=(((1,), (1,)), ((), ())),
        preferred_element_type=jnp.float32)
    h = jnp.maximum(h + b1_ref[...], 0.0)          # b1 (HID_PAD, 1) broadcast over lanes
    # fc2: (1, HID_PAD) @ (HID_PAD, TILE_B) -> (1, TILE_B), f32.  Tiny next to
    # fc1 (HIDDEN/IN_FEATURES of its FLOPs), so MXU slack covers it.
    y = jnp.dot(w2_ref[...], h, preferred_element_type=jnp.float32) + b2_ref[...]
    # Sigmoid: exp on the EUP, divide expressed as a reciprocal (stays off the
    # VALU slot).  approx=True would use the EUP vrcp at ~1e-3 error; keep the
    # exact form so results match the PyTorch reference to f32 precision.
    o_ref[...] = pl.reciprocal(1.0 + jnp.exp(-y)).astype(o_ref.dtype)


def _pack_params(w1, b1, w2, b2, compute_dtype):
    """PyTorch-layout params -> kernel-resident, HIDDEN-padded layouts."""
    w1p = jnp.zeros((HIDDEN_PAD, IN_FEATURES), jnp.float32).at[:HIDDEN].set(
        w1.astype(jnp.float32))
    b1p = jnp.zeros((HIDDEN_PAD, 1), jnp.float32).at[:HIDDEN, 0].set(
        b1.astype(jnp.float32))
    w2p = jnp.zeros((1, HIDDEN_PAD), jnp.float32).at[0, :HIDDEN].set(
        w2.reshape(-1).astype(jnp.float32))
    b2p = b2.reshape(1, 1).astype(jnp.float32)
    if compute_dtype is not None:
        w1p = w1p.astype(compute_dtype)   # fc1 MXU inputs only; rest stays f32
    return w1p, b1p, w2p, b2p


def net1b_forward(x, w1, b1, w2, b2, *, tile_b=2048, compute_dtype=None):
    """x: (B, 131) -> (B, 1), matching Net1b.forward.

    Params use PyTorch layouts: w1 (100, 131), b1 (100,), w2 (1, 100), b2 (1,).
    compute_dtype=jnp.bfloat16 halves the dominant HBM stream (x) and runs the
    fc1 matmul in native bf16 (f32 accumulate); everything else stays f32.
    """
    batch = x.shape[0]
    w1p, b1p, w2p, b2p = _pack_params(w1, b1, w2, b2, compute_dtype)
    if compute_dtype is not None:
        x = x.astype(compute_dtype)

    if batch <= tile_b:
        # Single block == full array dims (exempt from the (8,128) rule).
        tile, b_pad = batch, batch
    else:
        tile = tile_b
        b_pad = pl.cdiv(batch, tile) * tile
        if b_pad != batch:                # zero-pad ragged tail; sliced off below
            x = jnp.pad(x, ((0, b_pad - batch), (0, 0)))

    grid_spec = pltpu.PrefetchScalarGridSpec(
        num_scalar_prefetch=0,
        grid=(b_pad // tile,),
        in_specs=[
            # streamed batch tiles (auto double-buffered by the pipeline)
            pl.BlockSpec((tile, IN_FEATURES), lambda i: (i, 0)),
            # weights/biases: constant block index -> DMA'd once, VMEM-resident
            pl.BlockSpec((HIDDEN_PAD, IN_FEATURES), lambda i: (0, 0)),
            pl.BlockSpec((HIDDEN_PAD, 1), lambda i: (0, 0)),
            pl.BlockSpec((1, HIDDEN_PAD), lambda i: (0, 0)),
            pl.BlockSpec((1, 1), lambda i: (0, 0)),
        ],
        # lane-dense output row: batch on the lane axis
        out_specs=pl.BlockSpec((1, tile), lambda i: (0, i)),
    )

    out_t = pl.pallas_call(
        net1b_kernel,
        out_shape=jax.ShapeDtypeStruct((1, b_pad), jnp.float32),
        grid_spec=grid_spec,
        compiler_params=pltpu.CompilerParams(
            dimension_semantics=("parallel",)),   # shards batch over v7x's 2 TCs
    )(x, w1p, b1p, w2p, b2p)

    # (1, B_pad) -> (B, 1): pure reshape (same element order) + slice off pad.
    return out_t.reshape(-1, OUT_FEATURES)[:batch]


def init_params(key):
    """nn.Linear-style U(-1/sqrt(fan_in), 1/sqrt(fan_in)) init, PyTorch layouts."""
    k1, k2, k3, k4 = jax.random.split(key, 4)
    bound1 = 1.0 / jnp.sqrt(jnp.float32(IN_FEATURES))
    bound2 = 1.0 / jnp.sqrt(jnp.float32(HIDDEN))
    w1 = jax.random.uniform(k1, (HIDDEN, IN_FEATURES), jnp.float32,
                            minval=-bound1, maxval=bound1)
    b1 = jax.random.uniform(k2, (HIDDEN,), jnp.float32,
                            minval=-bound1, maxval=bound1)
    w2 = jax.random.uniform(k3, (OUT_FEATURES, HIDDEN), jnp.float32,
                            minval=-bound2, maxval=bound2)
    b2 = jax.random.uniform(k4, (OUT_FEATURES,), jnp.float32,
                            minval=-bound2, maxval=bound2)
    return w1, b1, w2, b2


if __name__ == "__main__":
    key = jax.random.PRNGKey(0)
    k_params, k_x1, k_x2 = jax.random.split(key, 3)
    w1, b1, w2, b2 = init_params(k_params)

    def reference(xv):
        h = jnp.maximum(xv @ w1.T + b1, 0.0)
        return jax.nn.sigmoid(h @ w2.T + b2)

    # 1) Small batch (single tile, block == full array dims), f32.
    x_small = jax.random.uniform(k_x1, (8, IN_FEATURES), jnp.float32)
    out_small = jax.block_until_ready(net1b_forward(x_small, w1, b1, w2, b2))
    assert out_small.shape == (8, OUT_FEATURES)
    assert jnp.allclose(out_small, reference(x_small), atol=1e-5, rtol=1e-5)

    # 2) Multi-tile grid with a ragged batch (300 rows, tile 128 -> padded to 384), f32.
    x_big = jax.random.uniform(k_x2, (300, IN_FEATURES), jnp.float32)
    out_big = jax.block_until_ready(
        net1b_forward(x_big, w1, b1, w2, b2, tile_b=128))
    assert out_big.shape == (300, OUT_FEATURES)
    assert jnp.allclose(out_big, reference(x_big), atol=1e-5, rtol=1e-5)

    # 3) bf16 fc1 inputs (HBM-bandwidth optimization for v6e/v7x), looser tolerance.
    out_bf16 = jax.block_until_ready(
        net1b_forward(x_big, w1, b1, w2, b2, tile_b=128,
                      compute_dtype=jnp.bfloat16))
    assert out_bf16.shape == (300, OUT_FEATURES)
    assert jnp.allclose(out_bf16, reference(x_big), atol=3e-2, rtol=3e-2)

    print("KERNEL_OK")
</pallas_src>

<mosaic_0001>
module attributes {stable_mosaic.version = 11 : i64} {
  func.func @net1b_kernel(%arg0: i32, %arg1: memref<8x131xf32, #tpu.memory_space<vmem>>, %arg2: memref<128x131xf32, #tpu.memory_space<vmem>>, %arg3: memref<128x1xf32, #tpu.memory_space<vmem>>, %arg4: memref<1x128xf32, #tpu.memory_space<vmem>>, %arg5: memref<1x1xf32, #tpu.memory_space<vmem>>, %arg6: memref<1x8xf32, #tpu.memory_space<vmem>>) attributes {dimension_semantics = [#tpu.dimension_semantics<parallel>], iteration_bounds = array<i64: 1>, scalar_prefetch = 0 : i64, scratch_operands = 0 : i64, tpu.core_type = #tpu.core_type<tc>, window_params = [{transform_indices = @transform_0, window_bounds = array<i64: 8, 131>}, {pipeline_mode = #tpu.pipeline_mode<synchronous>, transform_indices = @transform_1, window_bounds = array<i64: 128, 131>}, {pipeline_mode = #tpu.pipeline_mode<synchronous>, transform_indices = @transform_2, window_bounds = array<i64: 128, 1>}, {pipeline_mode = #tpu.pipeline_mode<synchronous>, transform_indices = @transform_3, window_bounds = array<i64: 1, 128>}, {pipeline_mode = #tpu.pipeline_mode<synchronous>, transform_indices = @transform_4, window_bounds = array<i64: 1, 1>}, {transform_indices = @transform_5, window_bounds = array<i64: 1, 8>}]} {
    %c0 = arith.constant 0 : index
    %c0_0 = arith.constant 0 : index
    %0 = vector.load %arg2[%c0, %c0_0] : memref<128x131xf32, #tpu.memory_space<vmem>>, vector<128x131xf32>
    %c0_1 = arith.constant 0 : index
    %c0_2 = arith.constant 0 : index
    %1 = vector.load %arg1[%c0_1, %c0_2] : memref<8x131xf32, #tpu.memory_space<vmem>>, vector<8x131xf32>
    %cst = arith.constant dense<0.000000e+00> : vector<128x8xf32>
    %2 = tpu.matmul %0, %1, %cst {dimension_numbers = #tpu.dot_dimension_numbers<[1], [1], [0], [0], [0, 0, 1, 0], [], []>} : vector<128x131xf32>, vector<8x131xf32>, vector<128x8xf32> -> vector<128x8xf32>
    %c0_3 = arith.constant 0 : index
    %c0_4 = arith.constant 0 : index
    %3 = vector.load %arg3[%c0_3, %c0_4] : memref<128x1xf32, #tpu.memory_space<vmem>>, vector<128x1xf32>
    %4 = vector.broadcast %3 : vector<128x1xf32> to vector<128x8xf32>
    %5 = arith.addf %2, %4 : vector<128x8xf32>
    %cst_5 = arith.constant 0.000000e+00 : f32
    %6 = vector.broadcast %cst_5 : f32 to vector<128x8xf32>
    %7 = arith.maximumf %5, %6 : vector<128x8xf32>
    %c0_6 = arith.constant 0 : index
    %c0_7 = arith.constant 0 : index
    %8 = vector.load %arg4[%c0_6, %c0_7] : memref<1x128xf32, #tpu.memory_space<vmem>>, vector<1x128xf32>
    %cst_8 = arith.constant dense<0.000000e+00> : vector<1x8xf32>
    %9 = tpu.matmul %8, %7, %cst_8 {dimension_numbers = #tpu.dot_dimension_numbers<[1], [0], [0], [1], [0, 0, 1, 1], [], []>} : vector<1x128xf32>, vector<128x8xf32>, vector<1x8xf32> -> vector<1x8xf32>
    %c0_9 = arith.constant 0 : index
    %c0_10 = arith.constant 0 : index
    %10 = vector.load %arg5[%c0_9, %c0_10] : memref<1x1xf32, #tpu.memory_space<vmem>>, vector<1x1xf32>
    %11 = vector.broadcast %10 : vector<1x1xf32> to vector<1x8xf32>
    %12 = arith.addf %9, %11 : vector<1x8xf32>
    %cst_11 = arith.constant 0.000000e+00 : f32
    %13 = vector.broadcast %cst_11 : f32 to vector<1x8xf32>
    %14 = arith.subf %13, %12 : vector<1x8xf32>
    %15 = math.exp %14 : vector<1x8xf32>
    %cst_12 = arith.constant 1.000000e+00 : f32
    %16 = vector.broadcast %cst_12 : f32 to vector<1x8xf32>
    %17 = arith.addf %16, %15 : vector<1x8xf32>
    %18 = tpu.reciprocal %17 : vector<1x8xf32> -> vector<1x8xf32>
    %c0_13 = arith.constant 0 : index
    %c0_14 = arith.constant 0 : index
    %19 = vector.load %arg6[%c0_13, %c0_14] : memref<1x8xf32, #tpu.memory_space<vmem>>, vector<1x8xf32>
    tpu.vector_store %arg6[%c0_13, %c0_14], %18 {strides = array<i32>} : memref<1x8xf32, #tpu.memory_space<vmem>>, vector<1x8xf32>,
    return
  }
  func.func @transform_0(%arg0: i32) -> (i32, i32) {
    %c0_i32 = arith.constant 0 : i32
    %c0_i32_0 = arith.constant 0 : i32
    return %arg0, %c0_i32 : i32, i32
  }
  func.func @transform_1(%arg0: i32) -> (i32, i32) {
    %c0_i32 = arith.constant 0 : i32
    %c0_i32_0 = arith.constant 0 : i32
    %c0_i32_1 = arith.constant 0 : i32
    return %c0_i32, %c0_i32_0 : i32, i32
  }
  func.func @transform_2(%arg0: i32) -> (i32, i32) {
    %c0_i32 = arith.constant 0 : i32
    %c0_i32_0 = arith.constant 0 : i32
    %c0_i32_1 = arith.constant 0 : i32
    return %c0_i32, %c0_i32_0 : i32, i32
  }
  func.func @transform_3(%arg0: i32) -> (i32, i32) {
    %c0_i32 = arith.constant 0 : i32
    %c0_i32_0 = arith.constant 0 : i32
    %c0_i32_1 = arith.constant 0 : i32
    return %c0_i32, %c0_i32_0 : i32, i32
  }
  func.func @transform_4(%arg0: i32) -> (i32, i32) {
    %c0_i32 = arith.constant 0 : i32
    %c0_i32_0 = arith.constant 0 : i32
    %c0_i32_1 = arith.constant 0 : i32
    return %c0_i32, %c0_i32_0 : i32, i32
  }
  func.func @transform_5(%arg0: i32) -> (i32, i32) {
    %c0_i32 = arith.constant 0 : i32
    %c0_i32_0 = arith.constant 0 : i32
    return %c0_i32, %arg0 : i32, i32
  }
}

</mosaic_0001>

<bundles_post_ra>
// kernel: tpu_custom_call.1
= control target key start
LH: loop header
LB: loop body
LE: loop exit
PB: predicated region body
PF: predicated region fallthrough
CT: control target
= control target key end

     0   :  { %s824_s0 = inlined_call_operand.vmem [shape: f32[8,131], index: 0, kind: input, shape index: {}]   ;;  %s825_s1 = inlined_call_operand.vmem [shape: f32[128,131], index: 1, kind: input, shape index: {}]   ;;  %s826_s2 = inlined_call_operand.vmem [shape: f32[128,1], index: 2, kind: input, shape index: {}]   ;;  %s827_s3 = inlined_call_operand.vmem [shape: f32[1,128], index: 3, kind: input, shape index: {}]   ;;  %s828_s4 = inlined_call_operand.<no memory space> [shape: f32[1,1], index: 4, kind: input, shape index: {}]   ;;  %s829_s5 = inlined_call_operand.hbm [shape: f32[1,8], index: 5, kind: output, shape index: {}]  }
   0x1   :  { %v10_v0 = vstv %s828_s4 }
   0x2   :  { %11 = vst [vmem:[#allocation2] sm:$0x1] %v10_v0 }
   0x3   :  { %v56_v1 = vld [vmem:[%s824_s0 + $0x8] sm:$0xff]  ;;  %vm153_vm0 = vcmask 23552   ;;  %v55_v2 = vld [vmem:[%s824_s0] sm:$0xff]  ;;  %v596_v5 = vmov 0   ;;  %v26_v6 = vld [vmem:[%s825_s1 + $0x18] sm:$0xff] }
   0x4   :  { %v24_v3 = vld [vmem:[%s825_s1 + $0x8] sm:$0xff]  ;;  %468 = vmatprep.subr.msk.mxu0 %vm153_vm0, %v56_v1  ;;  %v23_v4 = vld [vmem:[%s825_s1] sm:$0xff]  ;;  %566 = vset.pattern.permute.xlu0 %v596_v5  ;;  %v25_v7 = vld [vmem:[%s825_s1 + $0x10] sm:$0xff] }
   0x5   :  { %469 = vmatprep.mubr.msk.f32.mxu0 %vm153_vm0, %v24_v3  ;;  %206 = vmatpush1.xpose.msra.mxu0 %v55_v2  ;;  %v28_v8 = vld [vmem:[%s825_s1 + $0x28] sm:$0xff]  ;;  %v27_v9 = vld [vmem:[%s825_s1 + $0x20] sm:$0xff]  ;;  %v30_v10 = vld [vmem:[%s825_s1 + $0x38] sm:$0xff] }
   0x6   :  { %567 = vset.pattern.permute.xlu1 %v596_v5  ;;  %v57_v11 = vld [vmem:[%s826_s2] sm:$0xff]  ;;  %v59_v12 = vld [vmem:[%s826_s2 + $0x10] sm:$0xff]  ;;  %v58_v13 = vld [vmem:[%s826_s2 + $0x8] sm:$0xff] }
   0x7   :  { %75 = vperm.xlu0 %566, %v57_v11   ;;  %85 = vperm.xlu1 %567, %v59_v12   ;;  %v29_v14 = vld [vmem:[%s825_s1 + $0x30] sm:$0xff]  ;;  %v60_v15 = vld [vmem:[%s826_s2 + $0x18] sm:$0xff]  ;;  %v32_v16 = vld [vmem:[%s825_s1 + $0x48] sm:$0xff] }
   0x8   :  { %270 = vmatmul.mubr.f32.vlgmr.msra.gmra.mrb[0].mxu0 %v23_v4  ;;  %v61_v17 = vld [vmem:[%s826_s2 + $0x20] sm:$0xff] }
   0x9   :  { %470 = vmatprep.mubr.msk.f32.mxu0 %vm153_vm0, %v26_v6 }
   0xb   :  { %80 = vperm.xlu0 %566, %v58_v13   ;;  %90 = vperm.xlu1 %567, %v60_v15  }
   0xc   :  { %275 = vmatmul.mubr.f32.gmra.mrb[2].mxu0 %v25_v7 }
   0xd   :  { %471 = vmatprep.mubr.msk.f32.mxu0 %vm153_vm0, %v28_v8 }
  0x10   :  { %280 = vmatmul.mubr.f32.gmra.mrb[4].mxu0 %v27_v9 }
  0x11   :  { %472 = vmatprep.mubr.msk.f32.mxu0 %vm153_vm0, %v30_v10 }
  0x14   :  { %285 = vmatmul.mubr.f32.gmra.mrb[6].mxu0 %v29_v14 }
  0x15   :  { %12 = vsyncpa [#allocation4], 0  ;;  %473 = vmatprep.mubr.msk.f32.mxu0 %vm153_vm0, %v32_v16  ;;  %v31_v18 = vld [vmem:[%s825_s1 + $0x40] sm:$0xff]  ;;  %v62_v19 = vld [vmem:[%s826_s2 + $0x28] sm:$0xff]  ;;  %95 = vperm.xlu0 %566, %v61_v17   ;;  %v597_v53 = vmov 0.0|0.0   ;;  %vm598_vm1 = vmmov 0  }
  0x16   :  { %v34_v20 = vld [vmem:[%s825_s1 + $0x58] sm:$0xff]  ;;  %v63_v21 = vld [vmem:[%s826_s2 + $0x30] sm:$0xff]  ;;  %100 = vperm.xlu1 %567, %v62_v19   ;;  %v36_v24 = vld [vmem:[%s825_s1 + $0x68] sm:$0xff]  ;;  %537 = vmatprep.subr.bf16.mxu1 %v597_v53  ;;  %v599_v54 = vmov 0.0   ;;  %s600_s12 = smov [#allocation3]   ;;  %vm452_vm2 = vcmask 57344  }
  0x17   :  { %v33_v22 = vld [vmem:[%s825_s1 + $0x50] sm:$0xff]  ;;  %v64_v23 = vld [vmem:[%s826_s2 + $0x38] sm:$0xff]  ;;  %v65_v25 = vld [vmem:[%s826_s2 + $0x40] sm:$0xff]  ;;  %534 = vmatprep.mubr.msk.f32.mxu1 %vm598_vm1, %v599_v54  ;;  %s460_s13 = sshll.u32 %s600_s12, 4  ;;  %s461_s13 = int_to_ptr.vmem [resolvable:$true] %s460_s13 }
  0x18   :  { %290 = vmatmul.mubr.f32.gmra.mrb[8].mxu0 %v31_v18  ;;  %v35_v26 = vld [vmem:[%s825_s1 + $0x60] sm:$0xff]  ;;  %v66_v27 = vld [vmem:[%s826_s2 + $0x48] sm:$0xff]  ;;  %v38_v28 = vld [vmem:[%s825_s1 + $0x78] sm:$0xff]  ;;  %s576_s14 = scalar_lea.vmem %s461_s13, 32  ;;  %p577_p1 = scmp.lt.s32.totalorder %s461_s13, %s461_s13 }
  0x19   :  { %474 = vmatprep.mubr.msk.f32.mxu0 %vm153_vm0, %v34_v20  ;;  %105 = vperm.xlu0 %566, %v63_v21   ;;  %v67_v29 = vld [vmem:[%s826_s2 + $0x50] sm:$0xff]  ;;  %v68_v31 = vld [vmem:[%s826_s2 + $0x58] sm:$0xff]  ;;  %v40_v32 = vld [vmem:[%s825_s1 + $0x88] sm:$0xff] }
  0x1a   :  { %110 = vperm.xlu1 %567, %v64_v23   ;;  %v37_v30 = vld [vmem:[%s825_s1 + $0x70] sm:$0xff]  ;;  %v69_v33 = vld [vmem:[%s826_s2 + $0x60] sm:$0xff]  ;;  %v70_v35 = vld [vmem:[%s826_s2 + $0x68] sm:$0xff] }
  0x1b   :  { %v39_v34 = vld [vmem:[%s825_s1 + $0x80] sm:$0xff]  ;;  %v42_v36 = vld [vmem:[%s825_s1 + $0x98] sm:$0xff]  ;;  %v71_v37 = vld [vmem:[%s826_s2 + $0x70] sm:$0xff] }
  0x1c   :  { %295 = vmatmul.mubr.f32.gmra.mrb[10].mxu0 %v33_v22  ;;  %v41_v38 = vld [vmem:[%s825_s1 + $0x90] sm:$0xff]  ;;  %v72_v39 = vld [vmem:[%s826_s2 + $0x78] sm:$0xff]  ;;  %v44_v40 = vld [vmem:[%s825_s1 + $0xa8] sm:$0xff] }
  0x1d   :  { %475 = vmatprep.mubr.msk.f32.mxu0 %vm153_vm0, %v36_v24  ;;  %115 = vperm.xlu0 %566, %v65_v25   ;;  %v367_v41 = vld [vmem:[#allocation2] sm:$0x1]  ;;  %v46_v43 = vld [vmem:[%s825_s1 + $0xb8] sm:$0xff]  ;;  %v45_v44 = vld [vmem:[%s825_s1 + $0xb0] sm:$0xff] }
  0x1e   :  { %120 = vperm.xlu1 %567, %v66_v27   ;;  %v43_v42 = vld [vmem:[%s825_s1 + $0xa0] sm:$0xff]  ;;  %v48_v45 = vld [vmem:[%s825_s1 + $0xc8] sm:$0xff]  ;;  %v50_v47 = vld [vmem:[%s825_s1 + $0xd8] sm:$0xff] }
  0x1f   :  { %v47_v46 = vld [vmem:[%s825_s1 + $0xc0] sm:$0xff]  ;;  %v49_v48 = vld [vmem:[%s825_s1 + $0xd0] sm:$0xff]  ;;  %v52_v49 = vld [vmem:[%s825_s1 + $0xe8] sm:$0xff] }
  0x20   :  { %300 = vmatmul.mubr.f32.gmra.mrb[12].mxu0 %v35_v26  ;;  %v51_v50 = vld [vmem:[%s825_s1 + $0xe0] sm:$0xff]  ;;  %v54_v51 = vld [vmem:[%s825_s1 + $0xf8] sm:$0xff]  ;;  %v53_v52 = vld [vmem:[%s825_s1 + $0xf0] sm:$0xff] }
  0x21   :  { %476 = vmatprep.mubr.msk.f32.mxu0 %vm153_vm0, %v38_v28  ;;  %125 = vperm.xlu0 %566, %v67_v29  }
  0x22   :  { %130 = vperm.xlu1 %567, %v68_v31  }
  0x24   :  { %305 = vmatmul.mubr.f32.gmra.mrb[14].mxu0 %v37_v30 }
  0x25   :  { %477 = vmatprep.mubr.msk.f32.mxu0 %vm153_vm0, %v40_v32  ;;  %135 = vperm.xlu0 %566, %v69_v33  }
  0x26   :  { %140 = vperm.xlu1 %567, %v70_v35  }
  0x28   :  { %310 = vmatmul.mubr.f32.gmra.mrb[16].mxu0 %v39_v34 }
  0x29   :  { %478 = vmatprep.mubr.msk.f32.mxu0 %vm153_vm0, %v42_v36  ;;  %145 = vperm.xlu0 %566, %v71_v37  }
  0x2a   :  { %150 = vperm.xlu1 %567, %v72_v39  }
  0x2c   :  { %315 = vmatmul.mubr.f32.gmra.mrb[18].mxu0 %v41_v38 }
  0x2d   :  { %479 = vmatprep.mubr.msk.f32.mxu0 %vm153_vm0, %v44_v40  ;;  %370 = vperm.xlu0 %566, %v367_v41  }
  0x30   :  { %320 = vmatmul.mubr.f32.gmra.mrb[20].mxu0 %v43_v42 }
  0x31   :  { %480 = vmatprep.mubr.msk.f32.mxu0 %vm153_vm0, %v46_v43 }
  0x34   :  { %325 = vmatmul.mubr.f32.gmra.mrb[22].mxu0 %v45_v44 }
  0x35   :  { %481 = vmatprep.mubr.msk.f32.mxu0 %vm153_vm0, %v48_v45 }
  0x38   :  { %330 = vmatmul.mubr.f32.gmra.mrb[24].mxu0 %v47_v46 }
  0x39   :  { %482 = vmatprep.mubr.msk.f32.mxu0 %vm153_vm0, %v50_v47 }
  0x3c   :  { %335 = vmatmul.mubr.f32.gmra.mrb[26].mxu0 %v49_v48 }
  0x3d   :  { %483 = vmatprep.mubr.msk.f32.mxu0 %vm153_vm0, %v52_v49 }
  0x40   :  { %340 = vmatmul.mubr.f32.gmra.mrb[28].mxu0 %v51_v50 }
  0x41   :  { %484 = vmatprep.mubr.msk.f32.mxu0 %vm153_vm0, %v54_v51 }
  0x44   :  { %345 = vmatmul.mubr.f32.gmra.mrb[30].mxu0 %v53_v52 }
  0x86   :  { %v76_v55 = vpop.permute.xlu0 %75  ;;  %v86_v63 = vpop.permute.xlu1 %85 }
  0x8a   :  { %v81_v59 = vpop.permute.xlu0 %80  ;;  %v91_v6 = vpop.permute.xlu1 %90 }
  0x94   :  { %v96_v15 = vpop.permute.xlu0 %95 }
  0x95   :  { %v101_v17 = vpop.permute.xlu1 %100 }
  0x98   :  { %v106_v26 = vpop.permute.xlu0 %105 }
  0x99   :  { %v111_v28 = vpop.permute.xlu1 %110 }
  0x9c   :  { %v116_v37 = vpop.permute.xlu0 %115 }
  0x9d   :  { %v121_v39 = vpop.permute.xlu1 %120 }
  0xa0   :  { %v126_v48 = vpop.permute.xlu0 %125 }
  0xa1   :  { %v131_v50 = vpop.permute.xlu1 %130 }
  0xdb   :  { %v271_v56 = vpop.f32.mrb[0].mxu0 }
  0xdc   :  { %v273_v57 = vpop.f32.mrb[1].mxu0  ;;  %v272_v58 = vadd.f32 %v271_v56, %v76_v55 }
  0xde   :  { %v350_v0 = vmax.f32 %v272_v58, 0.0 }
  0xdf   :  { %v276_v60 = vpop.f32.mrb[2].mxu0 }
  0xe0   :  { %v277_v61 = vadd.f32 %v276_v60, %v81_v59  ;;  %v278_v62 = vpop.f32.mrb[3].mxu0  ;;  %v136_v60 = vpop.permute.xlu0 %135 }
  0xe1   :  { %v141_v62 = vpop.permute.xlu1 %140 }
  0xe2   :  { %v351_v1 = vmax.f32 %v277_v61, 0.0 }
  0xe3   :  { %v281_v2 = vpop.f32.mrb[4].mxu0 }
  0xe4   :  { %v283_v3 = vpop.f32.mrb[5].mxu0  ;;  %v538_v4 = vpack.c.bf16 %v351_v1, %v350_v0  ;;  %v282_v5 = vadd.f32 %v281_v2, %v86_v63 }
  0xe6   :  { %539 = vmatpush3.bf16.msra.mxu1 %v538_v4  ;;  %v352_v10 = vmax.f32 %v282_v5, 0.0 }
  0xe7   :  { %v286_v7 = vpop.f32.mrb[6].mxu0  ;;  %540 = vmatprep.subr.bf16.mxu1 %v597_v53 }
  0xe8   :  { %v287_v8 = vadd.f32 %v286_v7, %v91_v6  ;;  %v288_v9 = vpop.f32.mrb[7].mxu0  ;;  %v146_v7 = vpop.permute.xlu0 %145 }
  0xe9   :  { %v151_v9 = vpop.permute.xlu1 %150 }
  0xea   :  { %v353_v11 = vmax.f32 %v287_v8, 0.0 }
  0xeb   :  { %v291_v12 = vpop.f32.mrb[8].mxu0 }
  0xec   :  { %v541_v13 = vpack.c.bf16 %v353_v11, %v352_v10  ;;  %v293_v14 = vpop.f32.mrb[9].mxu0  ;;  %v292_v16 = vadd.f32 %v291_v12, %v96_v15 }
  0xee   :  { %542 = vmatpush3.bf16.msra.mxu1 %v541_v13  ;;  %v354_v21 = vmax.f32 %v292_v16, 0.0  ;;  %v366_v16 = vld [vmem:[%s827_s3] sm:$0x1]  ;;  %s572_s3 = scalar_lea.vmem %s461_s13, 16 }
  0xef   :  { %v296_v18 = vpop.f32.mrb[10].mxu0  ;;  %543 = vmatprep.subr.bf16.mxu1 %v597_v53  ;;  %p573_p0 = scmp.ne.s32.totalorder %s461_s13, %s572_s3  ;;  %p578_p2 = scmp.lt.s32.totalorder %s576_s14, %s572_s3 }
  0xf0   :  { %v297_v19 = vadd.f32 %v296_v18, %v101_v17  ;;  %v298_v20 = vpop.f32.mrb[11].mxu0  ;;  %v373_v17 = vlaneseq }
  0xf1   :  { %v371_v20 = vpop.permute.xlu0 %370  ;;  %p579_p3 = por %p578_p2, %p577_p1 }
  0xf2   :  { %v355_v22 = vmax.f32 %v297_v19, 0.0  ;;  %v374_v18 = vshrl.u32 %v373_v17, 7 }
  0xf3   :  { %v301_v23 = vpop.f32.mrb[12].mxu0  ;;  %p580_p4 = pnand %p579_p3, %p573_p0 }
  0xf4   :  { %v544_v24 = vpack.c.bf16 %v355_v22, %v354_v21  ;;  %v303_v25 = vpop.f32.mrb[13].mxu0  ;;  %v302_v27 = vadd.f32 %v301_v23, %v106_v26  ;;  %v375_v19 = vsub.s32 0, %v374_v18 }
  0xf6   :  { %545 = vmatpush3.bf16.msra.mxu1 %v544_v24  ;;  %v356_v32 = vmax.f32 %v302_v27, 0.0  ;;  %v376_v21 = vrot.slane %v371_v20, %v375_v19 }
  0xf7   :  { %v306_v29 = vpop.f32.mrb[14].mxu0  ;;  %546 = vmatprep.subr.bf16.mxu1 %v597_v53 }
  0xf8   :  { %v307_v30 = vadd.f32 %v306_v29, %v111_v28  ;;  %v308_v31 = vpop.f32.mrb[15].mxu0 }
  0xfa   :  { %v357_v33 = vmax.f32 %v307_v30, 0.0 }
  0xfb   :  { %v311_v34 = vpop.f32.mrb[16].mxu0 }
  0xfc   :  { %v547_v35 = vpack.c.bf16 %v357_v33, %v356_v32  ;;  %v313_v36 = vpop.f32.mrb[17].mxu0  ;;  %v312_v38 = vadd.f32 %v311_v34, %v116_v37 }
  0xfe   :  { %548 = vmatpush3.bf16.msra.mxu1 %v547_v35  ;;  %v358_v43 = vmax.f32 %v312_v38, 0.0 }
  0xff   :  { %v316_v40 = vpop.f32.mrb[18].mxu0  ;;  %549 = vmatprep.subr.bf16.mxu1 %v597_v53 }
 0x100   :  { %v317_v41 = vadd.f32 %v316_v40, %v121_v39  ;;  %v318_v42 = vpop.f32.mrb[19].mxu0 }
 0x102   :  { %v359_v44 = vmax.f32 %v317_v41, 0.0 }
 0x103   :  { %v321_v45 = vpop.f32.mrb[20].mxu0 }
 0x104   :  { %v550_v46 = vpack.c.bf16 %v359_v44, %v358_v43  ;;  %v323_v47 = vpop.f32.mrb[21].mxu0  ;;  %v322_v49 = vadd.f32 %v321_v45, %v126_v48 }
 0x106   :  { %551 = vmatpush3.bf16.msra.mxu1 %v550_v46  ;;  %v360_v55 = vmax.f32 %v322_v49, 0.0 }
 0x107   :  { %v326_v51 = vpop.f32.mrb[22].mxu0  ;;  %552 = vmatprep.subr.bf16.mxu1 %v597_v53 }
 0x108   :  { %v327_v52 = vadd.f32 %v326_v51, %v131_v50  ;;  %v328_v54 = vpop.f32.mrb[23].mxu0 }
 0x10a   :  { %v361_v56 = vmax.f32 %v327_v52, 0.0 }
 0x10b   :  { %v331_v57 = vpop.f32.mrb[24].mxu0 }
 0x10c   :  { %v553_v58 = vpack.c.bf16 %v361_v56, %v360_v55  ;;  %v333_v59 = vpop.f32.mrb[25].mxu0  ;;  %v332_v61 = vadd.f32 %v331_v57, %v136_v60 }
 0x10e   :  { %554 = vmatpush3.bf16.msra.mxu1 %v553_v58  ;;  %v362_v2 = vmax.f32 %v332_v61, 0.0 }
 0x10f   :  { %v336_v63 = vpop.f32.mrb[26].mxu0  ;;  %555 = vmatprep.subr.bf16.mxu1 %v597_v53 }
 0x110   :  { %v337_v0 = vadd.f32 %v336_v63, %v141_v62  ;;  %v338_v1 = vpop.f32.mrb[27].mxu0 }
 0x112   :  { %v363_v3 = vmax.f32 %v337_v0, 0.0 }
 0x113   :  { %v341_v4 = vpop.f32.mrb[28].mxu0 }
 0x114   :  { %v556_v5 = vpack.c.bf16 %v363_v3, %v362_v2  ;;  %v343_v6 = vpop.f32.mrb[29].mxu0  ;;  %v342_v8 = vadd.f32 %v341_v4, %v146_v7 }
 0x116   :  { %557 = vmatpush3.bf16.msra.mxu1 %v556_v5  ;;  %v364_v13 = vmax.f32 %v342_v8, 0.0 }
 0x117   :  { %v346_v10 = vpop.f32.mrb[30].mxu0  ;;  %558 = vmatprep.subr.bf16.mxu1 %v597_v53 }
 0x118   :  { %v347_v11 = vadd.f32 %v346_v10, %v151_v9  ;;  %v348_v12 = vpop.f32.mrb[31].mxu0 }
 0x11a   :  { %v365_v14 = vmax.f32 %v347_v11, 0.0 }
 0x11c   :  { %v559_v15 = vpack.c.bf16 %v365_v14, %v364_v13 }
 0x11e   :  { %560 = vmatpush3.bf16.msra.mxu1 %v559_v15 }
 0x121   :  { %535 = vmatmul.mubr.f32.vlgmr.msra.gmra.mrb[0].mxu1 %v366_v16 }
 0x1f4   :  { %v443_v22 = vpop.f32.mrb[0].mxu1 }
 0x1f5   :  { %v444_v23 = vadd.f32 %v443_v22, %v376_v21  ;;  %v536_v24 = vpop.f32.mrb[1].mxu1 }
 0x1f7   :  { %v447_v53 = vsub.f32 0.0, %v444_v23 }
 0x1f9   :  { %v448_v25 = vmul.f32 1.442695, %v447_v53 }
 0x1fb   :  { %568 = vpow2.f32 %v448_v25 }
 0x205   :  { %v569_v26 = vpop.eup %568 }
 0x206   :  { %v450_v27 = vadd.f32 1.0, %v569_v26 }
 0x208   :  { %570 = vrcp.f32 %v450_v27 }
 0x212   :  { %v571_v28 = vpop.eup %570 }
 0x213   :  { %453 = vst.msk [vmem:[#allocation3] sm:$0x1] %vm452_vm2, %v571_v28 }
 0x214   :  { %583 = shalt.err (!%p580_p4)
}
 0x215   :  { %s584_s17 = scalar_lea.hbm %s829_s5, 16 }
 0x216   :  { %p585_p5 = scmp.ne.s32.totalorder %s829_s5, %s584_s17  ;;  %p588_p6 = scmp.lt.u32.totalorder %s584_s17, %s829_s5 }
 0x218   :  { %p590_p7 = pnand %p588_p6, %p585_p5 }
 0x21a   :  { %593 = shalt.err (!%p590_p7)
}
 0x21b   :  { %463 = dma.vmem_to_hbm [thread:$0]  %s461_s13, 16, %s829_s5, [#allocation4]  }
 0x21c   :  { %594 = dma.done.wait [#allocation4], 16  }
 0x21d   :  { %595 = vsyncadd [#allocation4], 4294967280 }
 0x21e   :  { %467 = vsyncpa [#allocation4], 1 }

</bundles_post_ra>
